<compile_context>
chip_gen: v7x
topology: tpu7x:2x2x1
jax: 0.10.0
libtpu: 0.0.40
codegen_flags: <defaults>
</compile_context>

<pallas_src>
import functools

import jax
import jax.numpy as jnp
from jax.experimental import pallas as pl
from jax.experimental.pallas import tpu as pltpu


def _round_up(x, m):
    return (x + m - 1) // m * m


def part_encoder_kernel(idx_ref, tbl_ref, o_ref, *, bias_start):
    # idx_ref: (tn_p, 2*pack) int32 — per packed row, the 2*pack global table-row
    #          indices (aff/mat ids already shifted into their slot's block).
    # tbl_ref: (Kp, Lp) f32 — block-diagonal fused table + one packed-bias row,
    #          grid-invariant (resident in VMEM across grid steps).
    # o_ref  : (tn_p, Lp) — lane-dense packed output tile.
    n = idx_ref.shape[0]
    m = idx_ref.shape[1]
    kp = tbl_ref.shape[0]

    idx = idx_ref[...]
    iota = jax.lax.broadcasted_iota(jnp.int32, (n, kp), dimension=1)

    # Columns >= bias_start are always on: the single packed-bias row adds b to
    # every slot; trailing zero-pad rows contribute nothing.
    hit = iota >= bias_start
    for r in range(m):  # static unroll over the 2*pack id columns
        hit = jnp.logical_or(hit, iota == idx[:, r:r + 1])
    one_hot = hit.astype(jnp.float32)

    # One MXU matmul does both embedding lookups, the Linear, and the bias.
    y = jnp.dot(one_hot, tbl_ref[...], preferred_element_type=jnp.float32)

    # LeakyReLU (PyTorch default negative_slope = 0.01); cast only on store.
    o_ref[...] = jnp.where(y > 0, y, 0.01 * y).astype(o_ref.dtype)


@functools.partial(jax.jit, static_argnames=("tile_n", "pack", "out_dtype"))
def part_encoder_forward(parts, aff_emb_table, w, b, *,
                         tile_n=4096, pack=4, out_dtype=jnp.float32):
    """parts: (B, P, 2) int -> (B, P, D).

    aff_emb_table: (V, E) f32, w: (2E, D) f32, b: (D,) f32.
    pack: logical rows per physical output row (4 for v5e, 8 for v6e/v7x).
    out_dtype: jnp.float32 (exact) or jnp.bfloat16 (halved output writeback).
    """
    B, P, _ = parts.shape
    N = B * P
    V, E = aff_emb_table.shape
    D = w.shape[1]

    # ---- Algebraic fusion of embedding lookup with the Linear layer.
    # (Both lookups intentionally use the affordance table, matching PyTorch.)
    t_aff = jnp.dot(aff_emb_table, w[:E, :], preferred_element_type=jnp.float32)
    t_mat = jnp.dot(aff_emb_table, w[E:, :], preferred_element_type=jnp.float32)
    t_merged = jnp.concatenate([t_aff, t_mat], axis=0)            # (2V, D)

    # ---- Row-packed block-diagonal table + single packed-bias row.
    L = pack * D
    Lp = _round_up(L, 128)
    K = pack * 2 * V                         # lookup rows
    bias_start = K
    Kp = _round_up(K + 1, 8)                 # + bias row, sublane aligned

    table = jnp.kron(jnp.eye(pack, dtype=jnp.float32), t_merged)  # (K, L)
    bias_row = jnp.tile(b.astype(jnp.float32), pack)[None, :]     # (1, L)
    table = jnp.concatenate([table, bias_row], axis=0)            # (K+1, L)
    table = jnp.pad(table, ((0, Kp - (K + 1)), (0, Lp - L)))      # f32, ~100 KiB
    # TODO(synk): hoist this table construction (weights-only) out of the
    # per-call path when weights are reused across steps; at tiny N this op is
    # launch-bound and should be fused into the downstream consumer kernel.

    # ---- Tile sizing in packed rows; prefer >= 2 grid steps when there is
    # enough work so both v7x TensorCores get a share of the "parallel" axis.
    total_p = max(1, -(-N // pack))
    tn_p = _round_up(max(tile_n // pack, 8), 8)
    tn_p = min(tn_p, _round_up(total_p, 8))
    if total_p > 8 and _round_up(total_p, tn_p) // tn_p < 2:
        tn_p = _round_up(-(-total_p // 2), 8)
    Np_p = _round_up(total_p, tn_p)
    Np = Np_p * pack

    # ---- Pack ids: shift each logical row's (aff, mat) ids into its slot's
    # block of the merged table, then fold `pack` rows into one physical row.
    idx = parts.reshape(N, 2).astype(jnp.int32)
    idx = jnp.pad(idx, ((0, Np - N), (0, 0)))          # padding ids = 0 (sliced off)
    slot = jnp.arange(Np, dtype=jnp.int32) % pack
    g_aff = slot * (2 * V) + idx[:, 0]
    g_mat = slot * (2 * V) + V + idx[:, 1]
    g = jnp.stack([g_aff, g_mat], axis=-1).reshape(Np_p, 2 * pack)

    out = pl.pallas_call(
        functools.partial(part_encoder_kernel, bias_start=bias_start),
        out_shape=jax.ShapeDtypeStruct((Np_p, Lp), out_dtype),
        grid_spec=pltpu.PrefetchScalarGridSpec(
            num_scalar_prefetch=0,
            grid=(Np_p // tn_p,),
            in_specs=[
                pl.BlockSpec((tn_p, 2 * pack), lambda i: (i, 0)),  # packed ids
                pl.BlockSpec((Kp, Lp), lambda i: (0, 0)),          # resident table
            ],
            out_specs=pl.BlockSpec((tn_p, Lp), lambda i: (i, 0)),
        ),
        compiler_params=pltpu.CompilerParams(
            dimension_semantics=("parallel",)),   # shards rows across v7x's 2 TCs
    )(g, table)

    # Unpack: (Np_p, Lp) -> (Np_p, pack*D) -> (Np, D) -> (B, P, D).
    return out[:, :L].reshape(Np, D)[:N].reshape(B, P, D)


def reference_forward(parts, aff_emb_table, w, b):
    """Pure-JAX reference mirroring the PyTorch forward exactly."""
    aff_embeds = aff_emb_table[parts[:, :, 0]]
    mat_embeds = aff_emb_table[parts[:, :, 1]]  # same table, as in the PyTorch code
    part_embeds = jnp.concatenate([aff_embeds, mat_embeds], axis=-1)
    y = part_embeds @ w + b
    return jnp.where(y > 0, y, 0.01 * y)


if __name__ == "__main__":
    # Module hyper-parameters (affordance_embedding_dim == material_embedding_dim
    # is required for the original PyTorch forward to run at all, since it
    # concatenates two affordance-table lookups into the Linear's input).
    affordance_vocab_size = 11
    material_vocab_size = 7
    affordance_embedding_dim = 16
    material_embedding_dim = 16
    part_encoder_dim = 32

    key = jax.random.PRNGKey(0)
    k_aff, k_mat, k_w, k_b, k_pa, k_pm = jax.random.split(key, 6)

    aff_emb_table = jax.random.normal(
        k_aff, (affordance_vocab_size, affordance_embedding_dim), jnp.float32) * 0.1
    aff_emb_table = aff_emb_table.at[0].set(0.0)  # padding_idx=0

    # Material table exists in the module but is never used by forward
    # (the PyTorch code looks up the affordance table twice).
    mat_emb_table = jax.random.normal(
        k_mat, (material_vocab_size, material_embedding_dim), jnp.float32) * 0.1
    mat_emb_table = mat_emb_table.at[0].set(0.0)  # padding_idx=0  (unused)

    in_dim = affordance_embedding_dim + material_embedding_dim
    w = jax.random.normal(k_w, (in_dim, part_encoder_dim), jnp.float32) * 0.1
    b = jax.random.normal(k_b, (part_encoder_dim,), jnp.float32) * 0.1

    # ---- Small shape matching the module (batch=2, parts=8). ----
    B, P = 2, 8
    aff_ids = jax.random.randint(k_pa, (B, P), 0, affordance_vocab_size)
    mat_ids = jax.random.randint(k_pm, (B, P), 0, material_vocab_size)
    parts = jnp.stack([aff_ids, mat_ids], axis=-1).astype(jnp.int32)  # (2, 8, 2)

    ref = reference_forward(parts, aff_emb_table, w, b)

    # f32 output, pack=4 (works on all generations): tight tolerance.
    out = part_encoder_forward(parts, aff_emb_table, w, b, pack=4)
    out = jax.block_until_ready(out)
    assert out.shape == (B, P, part_encoder_dim)
    assert jnp.allclose(out, ref, atol=1e-5, rtol=1e-5), "f32/pack4 mismatch"

    # bf16 output, pack=8 (v6e/v7x production config): looser tolerance.
    out8 = part_encoder_forward(parts, aff_emb_table, w, b,
                                pack=8, out_dtype=jnp.bfloat16)
    out8 = jax.block_until_ready(out8)
    assert jnp.allclose(out8.astype(jnp.float32), ref, atol=2e-2, rtol=2e-2), \
        "bf16/pack8 mismatch"

    # ---- Odd-sized case to exercise row/pack padding and a 2-step grid. ----
    B2, P2 = 7, 37
    k_pa2, k_pm2 = jax.random.split(jax.random.PRNGKey(1), 2)
    parts2 = jnp.stack(
        [jax.random.randint(k_pa2, (B2, P2), 0, affordance_vocab_size),
         jax.random.randint(k_pm2, (B2, P2), 0, material_vocab_size)],
        axis=-1).astype(jnp.int32)
    ref2 = reference_forward(parts2, aff_emb_table, w, b)
    out2 = part_encoder_forward(parts2, aff_emb_table, w, b, pack=4)
    out2 = jax.block_until_ready(out2)
    assert jnp.allclose(out2, ref2, atol=1e-5, rtol=1e-5), "multi-step mismatch"

    print("KERNEL_OK")
</pallas_src>

<mosaic_0001>
module attributes {stable_mosaic.version = 11 : i64} {
  func.func @part_encoder_kernel(%arg0: i32, %arg1: memref<8x8xi32, #tpu.memory_space<vmem>>, %arg2: memref<96x128xf32, #tpu.memory_space<vmem>>, %arg3: memref<8x128xf32, #tpu.memory_space<vmem>>) attributes {dimension_semantics = [#tpu.dimension_semantics<parallel>], iteration_bounds = array<i64: 1>, scalar_prefetch = 0 : i64, scratch_operands = 0 : i64, tpu.core_type = #tpu.core_type<tc>, window_params = [{transform_indices = @transform_0, window_bounds = array<i64: 8, 8>}, {pipeline_mode = #tpu.pipeline_mode<synchronous>, transform_indices = @transform_1, window_bounds = array<i64: 96, 128>}, {transform_indices = @transform_2, window_bounds = array<i64: 8, 128>}]} {
    %c0 = arith.constant 0 : index
    %c0_0 = arith.constant 0 : index
    %0 = vector.load %arg1[%c0, %c0_0] : memref<8x8xi32, #tpu.memory_space<vmem>>, vector<8x8xi32>
    %1 = tpu.iota {dimensions = array<i32: 1>} : vector<8x96xi32>
    %c88_i32 = arith.constant 88 : i32
    %2 = vector.broadcast %c88_i32 : i32 to vector<8x96xi32>
    %3 = arith.cmpi sge, %1, %2 : vector<8x96xi32>
    %4 = vector.extract_strided_slice %0 {offsets = [0, 0], sizes = [8, 1], strides = [1, 1]} : vector<8x8xi32> to vector<8x1xi32>
    %5 = vector.broadcast %4 : vector<8x1xi32> to vector<8x96xi32>
    %6 = arith.cmpi eq, %1, %5 : vector<8x96xi32>
    %7 = arith.ori %3, %6 : vector<8x96xi1>
    %8 = vector.extract_strided_slice %0 {offsets = [0, 1], sizes = [8, 1], strides = [1, 1]} : vector<8x8xi32> to vector<8x1xi32>
    %9 = vector.broadcast %8 : vector<8x1xi32> to vector<8x96xi32>
    %10 = arith.cmpi eq, %1, %9 : vector<8x96xi32>
    %11 = arith.ori %7, %10 : vector<8x96xi1>
    %12 = vector.extract_strided_slice %0 {offsets = [0, 2], sizes = [8, 1], strides = [1, 1]} : vector<8x8xi32> to vector<8x1xi32>
    %13 = vector.broadcast %12 : vector<8x1xi32> to vector<8x96xi32>
    %14 = arith.cmpi eq, %1, %13 : vector<8x96xi32>
    %15 = arith.ori %11, %14 : vector<8x96xi1>
    %16 = vector.extract_strided_slice %0 {offsets = [0, 3], sizes = [8, 1], strides = [1, 1]} : vector<8x8xi32> to vector<8x1xi32>
    %17 = vector.broadcast %16 : vector<8x1xi32> to vector<8x96xi32>
    %18 = arith.cmpi eq, %1, %17 : vector<8x96xi32>
    %19 = arith.ori %15, %18 : vector<8x96xi1>
    %20 = vector.extract_strided_slice %0 {offsets = [0, 4], sizes = [8, 1], strides = [1, 1]} : vector<8x8xi32> to vector<8x1xi32>
    %21 = vector.broadcast %20 : vector<8x1xi32> to vector<8x96xi32>
    %22 = arith.cmpi eq, %1, %21 : vector<8x96xi32>
    %23 = arith.ori %19, %22 : vector<8x96xi1>
    %24 = vector.extract_strided_slice %0 {offsets = [0, 5], sizes = [8, 1], strides = [1, 1]} : vector<8x8xi32> to vector<8x1xi32>
    %25 = vector.broadcast %24 : vector<8x1xi32> to vector<8x96xi32>
    %26 = arith.cmpi eq, %1, %25 : vector<8x96xi32>
    %27 = arith.ori %23, %26 : vector<8x96xi1>
    %28 = vector.extract_strided_slice %0 {offsets = [0, 6], sizes = [8, 1], strides = [1, 1]} : vector<8x8xi32> to vector<8x1xi32>
    %29 = vector.broadcast %28 : vector<8x1xi32> to vector<8x96xi32>
    %30 = arith.cmpi eq, %1, %29 : vector<8x96xi32>
    %31 = arith.ori %27, %30 : vector<8x96xi1>
    %32 = vector.extract_strided_slice %0 {offsets = [0, 7], sizes = [8, 1], strides = [1, 1]} : vector<8x8xi32> to vector<8x1xi32>
    %33 = vector.broadcast %32 : vector<8x1xi32> to vector<8x96xi32>
    %34 = arith.cmpi eq, %1, %33 : vector<8x96xi32>
    %35 = arith.ori %31, %34 : vector<8x96xi1>
    %36 = arith.extui %35 : vector<8x96xi1> to vector<8x96xi32>
    %37 = arith.sitofp %36 : vector<8x96xi32> to vector<8x96xf32>
    %c0_1 = arith.constant 0 : index
    %c0_2 = arith.constant 0 : index
    %38 = vector.load %arg2[%c0_1, %c0_2] : memref<96x128xf32, #tpu.memory_space<vmem>>, vector<96x128xf32>
    %cst = arith.constant dense<0.000000e+00> : vector<8x128xf32>
    %39 = tpu.matmul %37, %38, %cst {dimension_numbers = #tpu.dot_dimension_numbers<[1], [0], [0], [1], [0, 0, 1, 1], [], []>} : vector<8x96xf32>, vector<96x128xf32>, vector<8x128xf32> -> vector<8x128xf32>
    %cst_3 = arith.constant 0.000000e+00 : f32
    %40 = vector.broadcast %cst_3 : f32 to vector<8x128xf32>
    %41 = arith.cmpf ogt, %39, %40 : vector<8x128xf32>
    %cst_4 = arith.constant 0.00999999977 : f32
    %42 = vector.broadcast %cst_4 : f32 to vector<8x128xf32>
    %43 = arith.mulf %42, %39 : vector<8x128xf32>
    %44 = arith.select %41, %39, %43 : vector<8x128xi1>, vector<8x128xf32>
    %c0_5 = arith.constant 0 : index
    %c0_6 = arith.constant 0 : index
    %45 = vector.load %arg3[%c0_5, %c0_6] : memref<8x128xf32, #tpu.memory_space<vmem>>, vector<8x128xf32>
    tpu.vector_store %arg3[%c0_5, %c0_6], %44 {strides = array<i32>} : memref<8x128xf32, #tpu.memory_space<vmem>>, vector<8x128xf32>,
    return
  }
  func.func @transform_0(%arg0: i32) -> (i32, i32) {
    %c0_i32 = arith.constant 0 : i32
    %c0_i32_0 = arith.constant 0 : i32
    return %arg0, %c0_i32 : i32, i32
  }
  func.func @transform_1(%arg0: i32) -> (i32, i32) {
    %c0_i32 = arith.constant 0 : i32
    %c0_i32_0 = arith.constant 0 : i32
    %c0_i32_1 = arith.constant 0 : i32
    return %c0_i32, %c0_i32_0 : i32, i32
  }
  func.func @transform_2(%arg0: i32) -> (i32, i32) {
    %c0_i32 = arith.constant 0 : i32
    %c0_i32_0 = arith.constant 0 : i32
    return %arg0, %c0_i32 : i32, i32
  }
}

</mosaic_0001>

<bundles_post_ra>
// kernel: tile.8
= control target key start
LH: loop header
LB: loop body
LE: loop exit
PB: predicated region body
PF: predicated region fallthrough
CT: control target
= control target key end

     0   :  { %s22_s0 = inlined_call_operand.vmem [shape: f32[32], index: 0, kind: input, shape index: {}]   ;;  %s23_s1 = inlined_call_operand.vmem [shape: f32[4,32], index: 1, kind: output, shape index: {}]  }
   0x1   :  { %v4_v0 = vld [vmem:[%s22_s0] ss:$0 sm:$0xff] }
   0x2   :  { %5 = vst [vmem:[%s23_s1] sm:$0xf] %v4_v0 }

// kernel: tile.9
= control target key start
LH: loop header
LB: loop body
LE: loop exit
PB: predicated region body
PF: predicated region fallthrough
CT: control target
= control target key end

     0   :  { %vm7_vm0 = vcmask 261120   ;;  %s37_s8 = smov 32   ;;  %s38_s9 = smov 64   ;;  %vm13_vm1 = vcmask 1048320   ;;  %vm19_vm2 = vcmask 785920   ;;  %vm25_vm3 = vcmask 523520   ;;  %s55_s0 = inlined_call_operand.vmem [shape: f32[4,32], index: 0, kind: input, shape index: {}]   ;;  %s56_s1 = inlined_call_operand.vmem [shape: f32[1,128], index: 1, kind: output, shape index: {}]  }
   0x1   :  { %v4_v0 = vld [vmem:[%s55_s0] sm:$0xf]  ;;  %s36_s0 = smov 96  }
   0x2   :  { %5 = vst [vmem:[#allocation1] sm:$0xf] %v4_v0 }
   0x9   :  { %v10_v1 = vld [vmem:[#allocation1 + $0x3] sm:$0x1]   ;;  %v22_v2 = vld [vmem:[#allocation1 + $0x1] sm:$0x1]   ;;  %v6_v3 = vld [vmem:[#allocation1] sm:$0x1]  }
   0xa   :  { %11 = vrot.lane.b32.xlu0 %v10_v1, %s36_s0  ;;  %23 = vrot.lane.b32.xlu1 %v22_v2, %s37_s8  ;;  %v16_v4 = vld [vmem:[#allocation1 + $0x2] sm:$0x1]   ;;  %8 = vst.msk [vmem:[#allocation0] sm:$0x1] %vm7_vm0, %v6_v3  }
   0xe   :  { %17 = vrot.lane.b32.xlu0 %v16_v4, %s38_s9 }
  0x7c   :  { %v12_v5 = vpop.permute.xlu0 %11   ;;  %v24_v6 = vpop.permute.xlu1 %23  }
  0x7d   :  { %14 = vst.msk [vmem:[#allocation0] sm:$0x1] %vm13_vm1, %v12_v5  }
  0x80   :  { %v18_v7 = vpop.permute.xlu0 %17  }
  0x81   :  { %20 = vst.msk [vmem:[#allocation0] sm:$0x1] %vm19_vm2, %v18_v7  }
  0x82   :  { %26 = vst.msk [vmem:[#allocation0] sm:$0x1] %vm25_vm3, %v24_v6  }
  0x89   :  { %v30_v8 = vld [vmem:[#allocation0] sm:$0x1] }
  0x8a   :  { %32 = vst [vmem:[%s56_s1] sm:$0x1] %v30_v8 }

// kernel: part_encoder_forward.1
= control target key start
LH: loop header
LB: loop body
LE: loop exit
PB: predicated region body
PF: predicated region fallthrough
CT: control target
= control target key end

     0   :  { %v231_v0 = vmov 2   ;;  %v232_v1 = vmov 0   ;;  %v233_v5 = vmov 0.0|0.0   ;;  %v234_v10 = vmov 3   ;;  %s299_s0 = inlined_call_operand.vmem [shape: s32[8,8], index: 0, kind: input, shape index: {}]   ;;  %s300_s1 = inlined_call_operand.vmem [shape: f32[96,128], index: 1, kind: input, shape index: {}]   ;;  %s301_s2 = inlined_call_operand.vmem [shape: f32[8,128], index: 2, kind: output, shape index: {}]  }
   0x1   :  { %224 = vset.pattern.permute.xlu1 %v231_v0  ;;  %222 = vset.pattern.permute.xlu0 %v232_v1  ;;  %v11_v2 = vld [vmem:[%s299_s0] sm:$0xff]  ;;  %v58_v4 = vld [vmem:[%s300_s1 + $0x8] sm:$0xff]  ;;  %v59_v7 = vld [vmem:[%s300_s1 + $0x10] sm:$0xff]  ;;  %v235_v11 = vmov 1   ;;  %v236_v15 = vmov 4   ;;  %v237_v16 = vmov 5   ;;  %v12_v29 = vlaneseq }
   0x2   :  { %v57_v3 = vld [vmem:[%s300_s1] sm:$0xff]  ;;  %26 = vperm.xlu1 %224, %v11_v2   ;;  %16 = vperm.xlu0 %222, %v11_v2   ;;  %v60_v8 = vld [vmem:[%s300_s1 + $0x18] sm:$0xff]  ;;  %v62_v13 = vld [vmem:[%s300_s1 + $0x28] sm:$0xff]  ;;  %v238_v22 = vmov 6   ;;  %v239_v23 = vmov 7   ;;  %vm240_vm0 = vmmov 0  }
   0x3   :  { %193 = vmatprep.subr.bf16.mxu0 %v233_v5  ;;  %v194_v6 = vpack.c.bf16 %v58_v4, %v57_v3  ;;  %v197_v9 = vpack.c.bf16 %v60_v8, %v59_v7  ;;  %v61_v12 = vld [vmem:[%s300_s1 + $0x20] sm:$0xff]  ;;  %v63_v17 = vld [vmem:[%s300_s1 + $0x30] sm:$0xff]  ;;  %v64_v18 = vld [vmem:[%s300_s1 + $0x38] sm:$0xff]  ;;  %v241_v28 = vmov 0.0   ;;  %v13_v32 = vand.u32 127, %v12_v29 }
   0x4   :  { %v200_v14 = vpack.c.bf16 %v62_v13, %v61_v12  ;;  %v203_v19 = vpack.c.bf16 %v64_v18, %v63_v17  ;;  %v65_v20 = vld [vmem:[%s300_s1 + $0x40] sm:$0xff]  ;;  %v66_v21 = vld [vmem:[%s300_s1 + $0x48] sm:$0xff]  ;;  %v67_v25 = vld [vmem:[%s300_s1 + $0x50] sm:$0xff]  ;;  %190 = vmatprep.mubr.msk.f32.mxu0 %vm240_vm0, %v241_v28 }
   0x5   :  { %195 = vmatpush3.bf16.msra.mxu0 %v194_v6  ;;  %v206_v24 = vpack.c.bf16 %v66_v21, %v65_v20  ;;  %v68_v26 = vld [vmem:[%s300_s1 + $0x58] sm:$0xff]  ;;  %vm14_vm1 = vcmp.ge.s32.totalorder %v13_v32, 88 }
   0x6   :  { %225 = vset.pattern.permute.xlu1 %v234_v10  ;;  %223 = vset.pattern.permute.xlu0 %v235_v11  ;;  %v209_v27 = vpack.c.bf16 %v68_v26, %v67_v25 }
   0x7   :  { %31 = vperm.xlu1 %225, %v11_v2   ;;  %21 = vperm.xlu0 %223, %v11_v2  }
   0x8   :  { %196 = vmatprep.subr.bf16.mxu0 %v233_v5 }
   0x9   :  { %198 = vmatpush3.bf16.msra.mxu0 %v197_v9 }
   0xa   :  { %199 = vmatprep.subr.bf16.mxu0 %v233_v5 }
   0xb   :  { %226 = vset.pattern.permute.xlu1 %v236_v15  ;;  %227 = vset.pattern.permute.xlu0 %v237_v16 }
   0xc   :  { %36 = vperm.xlu1 %226, %v11_v2   ;;  %41 = vperm.xlu0 %227, %v11_v2  }
   0xd   :  { %201 = vmatpush3.bf16.msra.mxu0 %v200_v14 }
   0xe   :  { %202 = vmatprep.subr.bf16.mxu0 %v233_v5 }
  0x10   :  { %228 = vset.pattern.permute.xlu1 %v238_v22  ;;  %230 = vset.pattern.permute.xlu0 %v239_v23 }
  0x11   :  { %46 = vperm.xlu1 %228, %v11_v2   ;;  %204 = vmatpush3.bf16.msra.mxu0 %v203_v19 }
  0x12   :  { %205 = vmatprep.subr.bf16.mxu0 %v233_v5 }
  0x15   :  { %229 = vset.pattern.permute.xlu1 %v239_v23  ;;  %207 = vmatpush3.bf16.msra.mxu0 %v206_v24 }
  0x16   :  { %51 = vperm.xlu1 %229, %v11_v2   ;;  %208 = vmatprep.subr.bf16.mxu0 %v233_v5 }
  0x19   :  { %210 = vmatpush3.bf16.msra.mxu0 %v209_v27 }
  0x81   :  { %v27_v30 = vpop.permute.xlu1 %26  ;;  %v17_v31 = vpop.permute.xlu0 %16 }
  0x82   :  { %vm18_vm2 = vcmp.eq.s32.totalorder %v13_v32, %v17_v31  ;;  %vm28_vm6 = vcmp.eq.s32.totalorder %v13_v32, %v27_v30 }
  0x83   :  { %vm19_vm3 = vmor %vm14_vm1, %vm18_vm2  ;;  %vm69_vm1 = vcmask 785408  }
  0x86   :  { %v32_v33 = vpop.permute.xlu1 %31  ;;  %v22_v34 = vpop.permute.xlu0 %21 }
  0x87   :  { %vm23_vm4 = vcmp.eq.s32.totalorder %v13_v32, %v22_v34  ;;  %vm33_vm9 = vcmp.eq.s32.totalorder %v13_v32, %v32_v33 }
  0x88   :  { %vm24_vm5 = vmor %vm19_vm3, %vm23_vm4 }
  0x89   :  { %vm29_vm7 = vmor %vm24_vm5, %vm28_vm6 }
  0x8a   :  { %vm34_vm10 = vmor %vm29_vm7, %vm33_vm9 }
  0x8b   :  { %v37_v35 = vpop.permute.xlu1 %36  ;;  %v42_v36 = vpop.permute.xlu0 %41 }
  0x8c   :  { %vm38_vm8 = vcmp.eq.s32.totalorder %v13_v32, %v37_v35  ;;  %vm43_vm12 = vcmp.eq.s32.totalorder %v13_v32, %v42_v36 }
  0x8d   :  { %vm39_vm11 = vmor %vm34_vm10, %vm38_vm8 }
  0x8e   :  { %vm44_vm14 = vmor %vm39_vm11, %vm43_vm12 }
  0x90   :  { %v47_v37 = vpop.permute.xlu1 %46 }
  0x91   :  { %vm48_vm13 = vcmp.eq.s32.totalorder %v13_v32, %v47_v37 }
  0x92   :  { %vm49_vm15 = vmor %vm44_vm14, %vm48_vm13 }
  0x95   :  { %v52_v38 = vpop.permute.xlu1 %51 }
  0x96   :  { %vm53_vm0 = vcmp.eq.s32.totalorder %v13_v32, %v52_v38 }
  0x97   :  { %vm54_vm2 = vmor %vm49_vm15, %vm53_vm0 }
  0x98   :  { %v151_v39 = vsel %vm54_vm2, 1.0, %v241_v28 }
  0x99   :  { %191 = vmatmul.mubr.msk.f32.vlgmr.msra.gmra.mrb[0].mxu0 %vm69_vm1, %v151_v39 }
 0x16c   :  { %v139_v40 = vpop.f32.mrb[0].mxu0 }
 0x16d   :  { %vm143_vm3 = vcmp.gt.f32.partialorder %v139_v40, 0.0  ;;  %v144_v41 = vmul.f32 0.01, %v139_v40  ;;  %v192_v42 = vpop.f32.mrb[1].mxu0 }
 0x16f   :  { %v145_v43 = vsel %vm143_vm3, %v139_v40, %v144_v41 }
 0x170   :  { %146 = vst [vmem:[%s301_s2] sm:$0xff] %v145_v43 }

</bundles_post_ra>
